<compile_context>
chip_gen: v7x
topology: tpu7x:2x2x1
jax: 0.10.0
libtpu: 0.0.40
codegen_flags: <defaults>
</compile_context>

<pallas_src>
import jax
import jax.numpy as jnp
from jax.experimental import pallas as pl
from jax.experimental.pallas import tpu as pltpu

IN_FEATURES = 28 * 28   # 784
HIDDEN = 128
OUT_FEATURES = 26
OUT_PAD = 128           # 26 padded to one full lane/MXU tile (unmasked stores)


def _round_up(x, m):
    return (x + m - 1) // m * m


def _choose_tile_b(batch, tile_b):
    """Batch tile: small batches use a single full-dim block; larger batches use a
    multiple-of-16 tile capped so the grid has >=2 steps (v7x 2-TC sharding)."""
    if batch <= 16:
        return batch                     # block dim == full array dim -> legal
    half = _round_up((batch + 1) // 2, 16)
    return max(16, min(tile_b, half))


def mlp_kernel(x_ref, w1_ref, b1_ref, w2_ref, b2_ref, o_ref):
    # fc1: cast the streamed f32 x tile to bf16 in-kernel, MXU matmul with f32
    # accumulation; bias + ReLU epilogue in f32 on the VPU.
    x = x_ref[...].astype(jnp.bfloat16)
    h = jnp.dot(x, w1_ref[...], preferred_element_type=jnp.float32)
    h = jnp.maximum(h + b1_ref[...], 0.0)
    # dropout(p=0.2): identity in inference mode.
    # fc2: zero-padded 128-wide output -> unmasked, lane-dense stores (bf16).
    out = jnp.dot(h.astype(jnp.bfloat16), w2_ref[...],
                  preferred_element_type=jnp.float32)
    o_ref[...] = (out + b2_ref[...]).astype(o_ref.dtype)


def prepare_params(w1, b1, w2, b2):
    """One-time pad/cast of the (tiny, VMEM-resident) weights.

    w1: (784, 128), b1: (128,) or (1, 128), w2: (128, 26), b2: (26,) or (1, 26)
    stored in (in, out) layout.
    """
    w1_p = w1.astype(jnp.bfloat16)                                  # (784, 128)
    b1_p = b1.reshape(1, HIDDEN).astype(jnp.float32)                # (1, 128)
    w2_p = jnp.zeros((HIDDEN, OUT_PAD), jnp.bfloat16)
    w2_p = w2_p.at[:, :OUT_FEATURES].set(w2.astype(jnp.bfloat16))   # (128, 128)
    b2_p = jnp.zeros((1, OUT_PAD), jnp.float32)
    b2_p = b2_p.at[:, :OUT_FEATURES].set(
        b2.reshape(1, OUT_FEATURES).astype(jnp.float32))            # (1, 128)
    return w1_p, b1_p, w2_p, b2_p


def net_forward(x, params, *, tile_b=1024):
    """x: any shape whose trailing dims flatten to 784 (e.g. (B, 1, 28, 28)).
    params: output of prepare_params().  Returns (B, 26) float32 logits."""
    w1_p, b1_p, w2_p, b2_p = params
    x2d = x.reshape(-1, IN_FEATURES)
    batch = x2d.shape[0]

    tb = _choose_tile_b(batch, tile_b)
    grid = (pl.cdiv(batch, tb),)

    flops = 2 * batch * IN_FEATURES * HIDDEN + 2 * batch * HIDDEN * OUT_PAD
    bytes_accessed = (x2d.size * x2d.dtype.itemsize
                      + w1_p.size * 2 + w2_p.size * 2
                      + b1_p.size * 4 + b2_p.size * 4
                      + batch * OUT_PAD * 2)

    out_padded = pl.pallas_call(
        mlp_kernel,
        out_shape=jax.ShapeDtypeStruct((batch, OUT_PAD), jnp.bfloat16),
        grid=grid,
        in_specs=[
            pl.BlockSpec((tb, IN_FEATURES), lambda i: (i, 0)),       # x tile (pipelined)
            pl.BlockSpec((IN_FEATURES, HIDDEN), lambda i: (0, 0)),   # w1 (resident)
            pl.BlockSpec((1, HIDDEN), lambda i: (0, 0)),             # b1 (resident)
            pl.BlockSpec((HIDDEN, OUT_PAD), lambda i: (0, 0)),       # w2 (resident)
            pl.BlockSpec((1, OUT_PAD), lambda i: (0, 0)),            # b2 (resident)
        ],
        out_specs=pl.BlockSpec((tb, OUT_PAD), lambda i: (i, 0)),
        compiler_params=pltpu.CompilerParams(
            dimension_semantics=("parallel",),
        ),
        cost_estimate=pl.CostEstimate(
            flops=flops, transcendentals=0, bytes_accessed=bytes_accessed),
    )(x2d, w1_p, b1_p, w2_p, b2_p)

    return out_padded[:, :OUT_FEATURES].astype(jnp.float32)


def init_params(key):
    k1, k2, k3, k4 = jax.random.split(key, 4)
    # Deterministic, roughly Kaiming-scaled init; stored as (in, out).
    w1 = jax.random.normal(k1, (IN_FEATURES, HIDDEN), jnp.float32) * (1.0 / IN_FEATURES) ** 0.5
    b1 = jax.random.normal(k2, (1, HIDDEN), jnp.float32) * 0.01
    w2 = jax.random.normal(k3, (HIDDEN, OUT_FEATURES), jnp.float32) * (1.0 / HIDDEN) ** 0.5
    b2 = jax.random.normal(k4, (1, OUT_FEATURES), jnp.float32) * 0.01
    return w1, b1, w2, b2


def _reference(x, w1, b1, w2, b2):
    """Plain-JAX references: bf16-operand/f32-acc recipe (tight) and full f32 (loose)."""
    x2d = x.reshape(-1, IN_FEATURES)
    h = jnp.maximum(
        jnp.dot(x2d.astype(jnp.bfloat16), w1.astype(jnp.bfloat16),
                preferred_element_type=jnp.float32) + b1, 0.0)
    ref_bf16 = jnp.dot(h.astype(jnp.bfloat16), w2.astype(jnp.bfloat16),
                       preferred_element_type=jnp.float32) + b2
    ref_f32 = jnp.maximum(x2d @ w1 + b1, 0.0) @ w2 + b2
    return ref_bf16, ref_f32


if __name__ == "__main__":
    key = jax.random.PRNGKey(0)
    kx, kx2, kp = jax.random.split(key, 3)

    w1, b1, w2, b2 = init_params(kp)
    params = prepare_params(w1, b1, w2, b2)   # hoisted one-time weight pad/cast

    # Case 1: MNIST-like NCHW input, tiny batch (single full-dim block).
    x = jax.random.normal(kx, (2, 1, 28, 28), jnp.float32)
    out = jax.block_until_ready(net_forward(x, params))
    assert out.shape == (2, OUT_FEATURES)
    ref_bf16, ref_f32 = _reference(x, w1, b1, w2, b2)
    assert jnp.allclose(out, ref_bf16, atol=5e-2, rtol=5e-2)
    assert jnp.allclose(out, ref_f32, atol=1e-1, rtol=1e-1)

    # Case 2: batch that is not a multiple of the tile -> exercises the >=2-step
    # grid and the partial (OOB-masked) final block, with no wrapper batch padding.
    x2 = jax.random.normal(kx2, (37, 1, 28, 28), jnp.float32)
    out2 = jax.block_until_ready(net_forward(x2, params))
    assert out2.shape == (37, OUT_FEATURES)
    ref2_bf16, ref2_f32 = _reference(x2, w1, b1, w2, b2)
    assert jnp.allclose(out2, ref2_bf16, atol=5e-2, rtol=5e-2)
    assert jnp.allclose(out2, ref2_f32, atol=1e-1, rtol=1e-1)

    print("KERNEL_OK")
</pallas_src>

<mosaic_0001>
module attributes {stable_mosaic.version = 11 : i64} {
  func.func @mlp_kernel(%arg0: i32, %arg1: memref<2x784xf32, #tpu.memory_space<vmem>>, %arg2: memref<784x128xbf16, #tpu.memory_space<vmem>>, %arg3: memref<1x128xf32, #tpu.memory_space<vmem>>, %arg4: memref<128x128xbf16, #tpu.memory_space<vmem>>, %arg5: memref<1x128xf32, #tpu.memory_space<vmem>>, %arg6: memref<2x128xbf16, #tpu.memory_space<vmem>>) attributes {dimension_semantics = [#tpu.dimension_semantics<parallel>], iteration_bounds = array<i64: 1>, scalar_prefetch = 0 : i64, scratch_operands = 0 : i64, tpu.core_type = #tpu.core_type<tc>, window_params = [{transform_indices = @transform_0, window_bounds = array<i64: 2, 784>}, {pipeline_mode = #tpu.pipeline_mode<synchronous>, transform_indices = @transform_1, window_bounds = array<i64: 784, 128>}, {pipeline_mode = #tpu.pipeline_mode<synchronous>, transform_indices = @transform_2, window_bounds = array<i64: 1, 128>}, {pipeline_mode = #tpu.pipeline_mode<synchronous>, transform_indices = @transform_3, window_bounds = array<i64: 128, 128>}, {pipeline_mode = #tpu.pipeline_mode<synchronous>, transform_indices = @transform_4, window_bounds = array<i64: 1, 128>}, {transform_indices = @transform_5, window_bounds = array<i64: 2, 128>}]} {
    %c0 = arith.constant 0 : index
    %c0_0 = arith.constant 0 : index
    %0 = vector.load %arg1[%c0, %c0_0] : memref<2x784xf32, #tpu.memory_space<vmem>>, vector<2x784xf32>
    %1 = arith.truncf %0 : vector<2x784xf32> to vector<2x784xbf16>
    %c0_1 = arith.constant 0 : index
    %c0_2 = arith.constant 0 : index
    %2 = vector.load %arg2[%c0_1, %c0_2] : memref<784x128xbf16, #tpu.memory_space<vmem>>, vector<784x128xbf16>
    %cst = arith.constant dense<0.000000e+00> : vector<2x128xf32>
    %3 = tpu.matmul %1, %2, %cst {dimension_numbers = #tpu.dot_dimension_numbers<[1], [0], [0], [1], [0, 0, 1, 1], [], []>} : vector<2x784xbf16>, vector<784x128xbf16>, vector<2x128xf32> -> vector<2x128xf32>
    %c0_3 = arith.constant 0 : index
    %c0_4 = arith.constant 0 : index
    %4 = vector.load %arg3[%c0_3, %c0_4] : memref<1x128xf32, #tpu.memory_space<vmem>>, vector<1x128xf32>
    %5 = vector.broadcast %4 : vector<1x128xf32> to vector<2x128xf32>
    %6 = arith.addf %3, %5 : vector<2x128xf32>
    %cst_5 = arith.constant 0.000000e+00 : f32
    %7 = vector.broadcast %cst_5 : f32 to vector<2x128xf32>
    %8 = arith.maximumf %6, %7 : vector<2x128xf32>
    %9 = arith.truncf %8 : vector<2x128xf32> to vector<2x128xbf16>
    %c0_6 = arith.constant 0 : index
    %c0_7 = arith.constant 0 : index
    %10 = vector.load %arg4[%c0_6, %c0_7] : memref<128x128xbf16, #tpu.memory_space<vmem>>, vector<128x128xbf16>
    %cst_8 = arith.constant dense<0.000000e+00> : vector<2x128xf32>
    %11 = tpu.matmul %9, %10, %cst_8 {dimension_numbers = #tpu.dot_dimension_numbers<[1], [0], [0], [1], [0, 0, 1, 1], [], []>} : vector<2x128xbf16>, vector<128x128xbf16>, vector<2x128xf32> -> vector<2x128xf32>
    %c0_9 = arith.constant 0 : index
    %c0_10 = arith.constant 0 : index
    %12 = vector.load %arg5[%c0_9, %c0_10] : memref<1x128xf32, #tpu.memory_space<vmem>>, vector<1x128xf32>
    %13 = vector.broadcast %12 : vector<1x128xf32> to vector<2x128xf32>
    %14 = arith.addf %11, %13 : vector<2x128xf32>
    %15 = arith.truncf %14 : vector<2x128xf32> to vector<2x128xbf16>
    %c0_11 = arith.constant 0 : index
    %c0_12 = arith.constant 0 : index
    %16 = vector.load %arg6[%c0_11, %c0_12] : memref<2x128xbf16, #tpu.memory_space<vmem>>, vector<2x128xbf16>
    tpu.vector_store %arg6[%c0_11, %c0_12], %15 {strides = array<i32>} : memref<2x128xbf16, #tpu.memory_space<vmem>>, vector<2x128xbf16>,
    return
  }
  func.func @transform_0(%arg0: i32) -> (i32, i32) {
    %c0_i32 = arith.constant 0 : i32
    %c0_i32_0 = arith.constant 0 : i32
    return %arg0, %c0_i32 : i32, i32
  }
  func.func @transform_1(%arg0: i32) -> (i32, i32) {
    %c0_i32 = arith.constant 0 : i32
    %c0_i32_0 = arith.constant 0 : i32
    %c0_i32_1 = arith.constant 0 : i32
    return %c0_i32, %c0_i32_0 : i32, i32
  }
  func.func @transform_2(%arg0: i32) -> (i32, i32) {
    %c0_i32 = arith.constant 0 : i32
    %c0_i32_0 = arith.constant 0 : i32
    %c0_i32_1 = arith.constant 0 : i32
    return %c0_i32, %c0_i32_0 : i32, i32
  }
  func.func @transform_3(%arg0: i32) -> (i32, i32) {
    %c0_i32 = arith.constant 0 : i32
    %c0_i32_0 = arith.constant 0 : i32
    %c0_i32_1 = arith.constant 0 : i32
    return %c0_i32, %c0_i32_0 : i32, i32
  }
  func.func @transform_4(%arg0: i32) -> (i32, i32) {
    %c0_i32 = arith.constant 0 : i32
    %c0_i32_0 = arith.constant 0 : i32
    %c0_i32_1 = arith.constant 0 : i32
    return %c0_i32, %c0_i32_0 : i32, i32
  }
  func.func @transform_5(%arg0: i32) -> (i32, i32) {
    %c0_i32 = arith.constant 0 : i32
    %c0_i32_0 = arith.constant 0 : i32
    return %arg0, %c0_i32 : i32, i32
  }
}

</mosaic_0001>

<bundles_post_ra>
// kernel: tpu_custom_call.1
= control target key start
LH: loop header
LB: loop body
LE: loop exit
PB: predicated region body
PF: predicated region fallthrough
CT: control target
= control target key end

     0   :  { %10 = vsyncpa [#allocation3], 0  ;;  %s1244_s0 = inlined_call_operand.hbm [shape: f32[2,784], index: 0, kind: input, shape index: {}]   ;;  %s1245_s1 = inlined_call_operand.hbm [shape: bf16[784,128], index: 1, kind: input, shape index: {}]   ;;  %s1246_s2 = inlined_call_operand.vmem [shape: f32[1,128], index: 2, kind: input, shape index: {}]   ;;  %s1247_s3 = inlined_call_operand.hbm [shape: bf16[128,128], index: 3, kind: input, shape index: {}]   ;;  %s1248_s4 = inlined_call_operand.vmem [shape: f32[1,128], index: 4, kind: input, shape index: {}]   ;;  %s1249_s5 = inlined_call_operand.hbm [shape: bf16[2,128], index: 5, kind: output, shape index: {}]  }
   0x1   :  { %11 = vsyncpa [#allocation6], 0 }
   0x2   :  { %12 = vsyncpa [#allocation4], 0  ;;  %s1131_s18 = smov [#allocation5]   ;;  %s1037_s22 = scalar_lea.hbm %s1245_s1, 6272 }
   0x3   :  { %s28_s19 = sshll.u32 %s1131_s18, 4  ;;  %p1038_p0 = scmp.ne.s32.totalorder %s1245_s1, %s1037_s22  ;;  %s29_s19 = int_to_ptr.vmem [resolvable:$true] %s28_s19 }
   0x4   :  { %p1041_p1 = scmp.lt.u32.totalorder %s1037_s22, %s1245_s1 }
   0x6   :  { %p1043_p2 = pnand %p1041_p1, %p1038_p0 }
   0x8   :  { %1046 = shalt.err (!%p1043_p2)
}
   0x9   :  { %s1047_s27 = scalar_lea.vmem %s29_s19, 6272  ;;  %p1052_p4 = scmp.lt.s32.totalorder %s29_s19, %s29_s19 }
   0xa   :  { %p1048_p3 = scmp.ne.s32.totalorder %s29_s19, %s1047_s27  ;;  %p1053_p5 = scmp.lt.s32.totalorder %s1047_s27, %s1047_s27 }
   0xc   :  { %p1054_p6 = por %p1053_p5, %p1052_p4 }
   0xe   :  { %p1055_p7 = pnand %p1054_p6, %p1048_p3 }
  0x10   :  { %1058 = shalt.err (!%p1055_p7)
}
  0x11   :  { %s1132_s28 = smov 64   ;;  %s1133_s29 = smov 4  }
  0x12   :  { %34 = dma.hbm_to_vmem [thread:$0]  %s1245_s1, 6272, %s29_s19, [#allocation6], %s1132_s28, %s1132_s28, %s1133_s29  }
  0x13   :  { %s1134_s7 = smov [#allocation2]   ;;  %s1135_s9 = smov [#allocation7]  }
  0x14   :  { %s19_s8 = sshll.u32 %s1134_s7, 4  ;;  %s42_s10 = sshll.u32 %s1135_s9, 4  ;;  %s20_s8 = int_to_ptr.vmem [resolvable:$true] %s19_s8  ;;  %s43_s10 = int_to_ptr.vmem [resolvable:$true] %s42_s10 }
  0x15   :  { %s1059_s13 = scalar_lea.hbm %s1244_s0, 224 }
  0x16   :  { %p1060_p8 = scmp.ne.s32.totalorder %s1244_s0, %s1059_s13  ;;  %p1063_p9 = scmp.lt.u32.totalorder %s1059_s13, %s1244_s0 }
  0x18   :  { %p1065_p10 = pnand %p1063_p9, %p1060_p8 }
  0x1a   :  { %1068 = shalt.err (!%p1065_p10)
}
  0x1b   :  { %s1069_s1 = scalar_lea.vmem %s20_s8, 224  ;;  %p1074_p12 = scmp.lt.s32.totalorder %s20_s8, %s20_s8 }
  0x1c   :  { %p1070_p11 = scmp.ne.s32.totalorder %s20_s8, %s1069_s1  ;;  %p1075_p13 = scmp.lt.s32.totalorder %s1069_s1, %s1069_s1 }
  0x1e   :  { %p1076_p0 = por %p1075_p13, %p1074_p12 }
  0x20   :  { %p1077_p1 = pnand %p1076_p0, %p1070_p11 }
  0x22   :  { %1080 = shalt.err (!%p1077_p1)
}
  0x23   :  { %22 = dma.hbm_to_vmem [thread:$0]  %s1244_s0, 224, %s20_s8, [#allocation3]  }
  0x24   :  { %s1081_s22 = scalar_lea.hbm %s1247_s3, 1024 }
  0x25   :  { %p1082_p2 = scmp.ne.s32.totalorder %s1247_s3, %s1081_s22  ;;  %p1085_p3 = scmp.lt.u32.totalorder %s1081_s22, %s1247_s3 }
  0x27   :  { %p1087_p4 = pnand %p1085_p3, %p1082_p2 }
  0x29   :  { %1090 = shalt.err (!%p1087_p4)
}
  0x2a   :  { %s1091_s27 = scalar_lea.vmem %s43_s10, 1024  ;;  %p1096_p6 = scmp.lt.s32.totalorder %s43_s10, %s43_s10 }
  0x2b   :  { %p1092_p5 = scmp.ne.s32.totalorder %s43_s10, %s1091_s27  ;;  %p1097_p7 = scmp.lt.s32.totalorder %s1091_s27, %s1091_s27 }
  0x2d   :  { %p1098_p8 = por %p1097_p7, %p1096_p6 }
  0x2f   :  { %p1099_p9 = pnand %p1098_p8, %p1092_p5 }
  0x31   :  { %1102 = shalt.err (!%p1099_p9)
}
  0x32   :  { %48 = dma.hbm_to_vmem [thread:$0]  %s1247_s3, 1024, %s43_s10, [#allocation6], %s1132_s28, %s1132_s28, %s1133_s29  }
  0x33   :  { %1125 = dma.done.wait [#allocation3], 224  }
  0x34   :  { %1126 = vsyncadd [#allocation3], 4294967072 }
  0x35   :  { %1127 = dma.done.wait [#allocation6], 7296  }
  0x36   :  { %1128 = vsyncadd [#allocation6], 4294960000  ;;  %v978_v0 = vld [vmem:[#allocation5 + $0x40] sm:$0xff]   ;;  %v982_v4 = vld [vmem:[#allocation5 + $0x48] sm:$0xff]   ;;  %v1136_v21 = vmov 1983009808   ;;  %v69_v23 = vlaneseq }
  0x37   :  { %v979_v1 = vld [vmem:[#allocation5] sm:$0xff]   ;;  %866 = vmatprep.subr.bf16.mxu0 %v978_v0  ;;  %v983_v5 = vld [vmem:[#allocation5 + $0x8] sm:$0xff]   ;;  %v986_v8 = vld [vmem:[#allocation5 + $0x50] sm:$0xff]   ;;  %v67_v22 = vunpack.c.l.s4 %v1136_v21  ;;  %v1137_v45 = vmov 0.0   ;;  %vm1138_vm0 = vmmov 0   ;;  %vm511_vm1 = vcmask 130048  }
  0x38   :  { %v980_v2 = vld [vmem:[#allocation5 + $0xc0] sm:$0xff]   ;;  %867 = vmatpush3.bf16.msra.mxu0 %v979_v1  ;;  %v984_v6 = vld [vmem:[#allocation5 + $0xc8] sm:$0xff]   ;;  %v987_v9 = vld [vmem:[#allocation5 + $0x10] sm:$0xff]   ;;  %v70_v29 = vshrl.u32 %v69_v23, 7  ;;  %s1139_s6 = smov [#allocation8]  }
  0x39   :  { %v981_v3 = vld [vmem:[#allocation5 + $0x80] sm:$0xff]   ;;  %888 = vmatprep.subr.bf16.mxu1 %v980_v2  ;;  %868 = vmatprep.subr.bf16.mxu0 %v982_v4  ;;  %v985_v7 = vld [vmem:[#allocation5 + $0x88] sm:$0xff]   ;;  %v988_v10 = vld [vmem:[#allocation5 + $0xd0] sm:$0xff]   ;;  %v68_v28 = vunpack.c.0.s8 %v67_v22  ;;  %s796_s7 = sshll.u32 %s1139_s6, 4  ;;  %s797_s7 = int_to_ptr.vmem [resolvable:$true] %s796_s7 }
  0x3a   :  { %889 = vmatpush3.bf16.msra.mxu1 %v981_v3  ;;  %v989_v11 = vld [vmem:[#allocation5 + $0x90] sm:$0xff]   ;;  %v990_v12 = vld [vmem:[#allocation5 + $0x58] sm:$0xff]   ;;  %v994_v16 = vld [vmem:[#allocation5 + $0x60] sm:$0xff]   ;;  %s1103_s8 = scalar_lea.vmem %s797_s7, 16  ;;  %s1107_s9 = scalar_lea.vmem %s797_s7, 32 }
  0x3b   :  { %890 = vmatprep.subr.bf16.mxu1 %v984_v6  ;;  %v991_v13 = vld [vmem:[#allocation5 + $0x18] sm:$0xff]   ;;  %v995_v17 = vld [vmem:[#allocation5 + $0x20] sm:$0xff]   ;;  %v998_v20 = vld [vmem:[#allocation5 + $0x68] sm:$0xff]   ;;  %v71_v34 = vsub.s32 %v68_v28, %v70_v29  ;;  %p1104_p10 = scmp.ne.s32.totalorder %s797_s7, %s1103_s8  ;;  %p1108_p11 = scmp.lt.s32.totalorder %s797_s7, %s797_s7 }
  0x3c   :  { %869 = vmatpush3.bf16.msra.mxu0 %v983_v5  ;;  %v992_v14 = vld [vmem:[#allocation5 + $0xd8] sm:$0xff]   ;;  %v996_v18 = vld [vmem:[#allocation5 + $0xe0] sm:$0xff]   ;;  %v999_v24 = vld [vmem:[#allocation5 + $0x28] sm:$0xff]   ;;  %p1109_p12 = scmp.lt.s32.totalorder %s1107_s9, %s1103_s8 }
  0x3d   :  { %870 = vmatprep.subr.bf16.mxu0 %v986_v8  ;;  %v993_v15 = vld [vmem:[#allocation5 + $0x98] sm:$0xff]   ;;  %v997_v19 = vld [vmem:[#allocation5 + $0xa0] sm:$0xff]   ;;  %v1000_v25 = vld [vmem:[#allocation5 + $0xe8] sm:$0xff]  }
  0x3e   :  { %891 = vmatpush3.bf16.msra.mxu1 %v985_v7  ;;  %v1001_v26 = vld [vmem:[#allocation5 + $0xa8] sm:$0xff]   ;;  %v1002_v27 = vld [vmem:[#allocation5 + $0x70] sm:$0xff]   ;;  %v1006_v33 = vld [vmem:[#allocation5 + $0x78] sm:$0xff]   ;;  %p1110_p13 = por %p1109_p12, %p1108_p11 }
  0x3f   :  { %892 = vmatprep.subr.bf16.mxu1 %v988_v10  ;;  %v1003_v30 = vld [vmem:[#allocation5 + $0x30] sm:$0xff]   ;;  %v1007_v35 = vld [vmem:[#allocation5 + $0x38] sm:$0xff]   ;;  %v1010_v41 = vld [vmem:[#allocation5 + $0x140] sm:$0xff]  }
  0x40   :  { %871 = vmatpush3.bf16.msra.mxu0 %v987_v9  ;;  %v1004_v31 = vld [vmem:[#allocation5 + $0xf0] sm:$0xff]   ;;  %v1008_v36 = vld [vmem:[#allocation5 + $0xf8] sm:$0xff]   ;;  %v1012_v48 = vld [vmem:[#allocation5 + $0x100] sm:$0xff]   ;;  %p1111_p0 = pnand %p1110_p13, %p1104_p10 }
  0x41   :  { %872 = vmatprep.subr.bf16.mxu0 %v990_v12  ;;  %v1005_v32 = vld [vmem:[#allocation5 + $0xb0] sm:$0xff]   ;;  %v1009_v39 = vld [vmem:[#allocation5 + $0xb8] sm:$0xff]   ;;  %v1013_v50 = vld [vmem:[#allocation5 + $0x148] sm:$0xff]  }
  0x42   :  { %893 = vmatpush3.bf16.msra.mxu1 %v989_v11  ;;  %v61_v37 = vld [vmem:[#allocation2] sm:$0xff]  ;;  %v1014_v52 = vld [vmem:[#allocation5 + $0x108] sm:$0xff]   ;;  %v1019_v57 = vld [vmem:[#allocation5 + $0x160] sm:$0xff]  }
  0x43   :  { %894 = vmatprep.subr.bf16.mxu1 %v992_v14  ;;  %v72_v38 = vrot.slane %v61_v37, %v71_v34  ;;  %v65_v40 = vcombine.high %v61_v37, %v61_v37  ;;  %v1015_v53 = vld [vmem:[#allocation5 + $0x150] sm:$0xff]   ;;  %v1017_v55 = vld [vmem:[#allocation5 + $0x158] sm:$0xff]   ;;  %v1027_v58 = vld [vmem:[#allocation5 + $0x180] sm:$0xff]  }
  0x44   :  { %873 = vmatpush3.bf16.msra.mxu0 %v991_v13  ;;  %v1016_v54 = vld [vmem:[#allocation5 + $0x110] sm:$0xff]   ;;  %v1018_v56 = vld [vmem:[#allocation5 + $0x118] sm:$0xff]   ;;  %v1020_v60 = vld [vmem:[#allocation5 + $0x120] sm:$0xff]  }
  0x45   :  { %874 = vmatprep.subr.bf16.mxu0 %v994_v16  ;;  %v80_v42 = vcombine.high %v72_v38, %v72_v38  ;;  %v79_v43 = vrot.slane %v65_v40, %v71_v34  ;;  %v105_v44 = vpack.c.bf16 %v72_v38, %v72_v38  ;;  %v62_v59 = vld [vmem:[#allocation2 + $0x8] sm:$0x3f]  ;;  %v1021_v63 = vld [vmem:[#allocation5 + $0x168] sm:$0xff]   ;;  %v1023_v5 = vld [vmem:[#allocation5 + $0x170] sm:$0xff]  }
  0x46   :  { %895 = vmatpush3.bf16.msra.mxu1 %v993_v15  ;;  %v82_v61 = vcombine.high %v62_v59, %v62_v59  ;;  %v89_v62 = vrot.slane %v62_v59, %v71_v34  ;;  %v1022_v4 = vld [vmem:[#allocation5 + $0x128] sm:$0xff]   ;;  %v1024_v6 = vld [vmem:[#allocation5 + $0x130] sm:$0xff]   ;;  %v1025_v7 = vld [vmem:[#allocation5 + $0x178] sm:$0xff]  }
  0x47   :  { %896 = vmatprep.subr.bf16.mxu1 %v996_v18  ;;  %v106_v46 = vpack.c.bf16 %v80_v42, %v80_v42  ;;  %v81_v47 = vcombine.high %v79_v43, %v79_v43  ;;  %v107_v49 = vpack.c.bf16 %v79_v43, %v79_v43  ;;  %v1026_v8 = vld [vmem:[#allocation5 + $0x138] sm:$0xff]   ;;  %v1029_v10 = vld [vmem:[#allocation7] sm:$0xff]   ;;  %v1030_v11 = vld [vmem:[#allocation7 + $0x8] sm:$0xff]  }
  0x48   :  { %875 = vmatpush3.bf16.msra.mxu0 %v995_v17  ;;  %v96_v0 = vrot.slane %v82_v61, %v71_v34  ;;  %v97_v1 = vcombine.high %v89_v62, %v89_v62  ;;  %v109_v9 = vpack.c.bf16 %v89_v62, %v89_v62  ;;  %v1031_v12 = vld [vmem:[#allocation7 + $0x10] sm:$0xff]   ;;  %v1032_v13 = vld [vmem:[#allocation7 + $0x18] sm:$0xff]   ;;  %v1033_v14 = vld [vmem:[#allocation7 + $0x20] sm:$0xff]  }
  0x49   :  { %876 = vmatprep.subr.bf16.mxu0 %v998_v20  ;;  %547 = vmatprep.mubr.bf16.mxu0 %v106_v46  ;;  %v108_v51 = vpack.c.bf16 %v81_v47, %v81_v47  ;;  %v1034_v15 = vld [vmem:[#allocation7 + $0x28] sm:$0xff]   ;;  %v1035_v16 = vld [vmem:[#allocation7 + $0x30] sm:$0xff]   ;;  %v1036_v17 = vld [vmem:[#allocation7 + $0x38] sm:$0xff]  }
  0x4a   :  { %897 = vmatpush3.bf16.msra.mxu1 %v997_v19  ;;  %v110_v2 = vpack.c.bf16 %v97_v1, %v97_v1  ;;  %v111_v3 = vpack.c.bf16 %v96_v0, %v96_v0  ;;  %v806_v19 = vld [vmem:[%s1246_s2] ss:$0 sm:$0xff] }
  0x4b   :  { %898 = vmatprep.subr.bf16.mxu1 %v1000_v25  ;;  %587 = vmatprep.mubr.bf16.mxu1 %v108_v51 }
  0x4c   :  { %877 = vmatpush3.bf16.msra.mxu0 %v999_v24 }
  0x4d   :  { %878 = vmatprep.subr.bf16.mxu0 %v1002_v27 }
  0x4e   :  { %899 = vmatpush3.bf16.msra.mxu1 %v1001_v26 }
  0x4f   :  { %900 = vmatprep.subr.bf16.mxu1 %v1004_v31 }
  0x50   :  { %879 = vmatpush3.bf16.msra.mxu0 %v1003_v30 }
  0x51   :  { %880 = vmatprep.subr.bf16.mxu0 %v1006_v33 }
  0x52   :  { %901 = vmatpush3.bf16.msra.mxu1 %v1005_v32 }
  0x53   :  { %902 = vmatprep.subr.bf16.mxu1 %v1008_v36 }
  0x54   :  { %881 = vmatpush3.bf16.msra.mxu0 %v1007_v35 }
  0x55   :  { %910 = vmatprep.subr.bf16.mxu0 %v1010_v41 }
  0x56   :  { %903 = vmatpush3.bf16.msra.mxu1 %v1009_v39 }
  0x57   :  { %943 = vmatprep.subr.bf16.mxu1 %v1137_v45  ;;  %548 = vmatmul.mubr.bf16.vlgmr.msra.gmra.mrb[0].mxu0 %v105_v44  ;;  %v857_v44 = vld [vmem:[%s1248_s4] ss:$0 sm:$0xff] }
  0x58   :  { %911 = vmatpush3.bf16.msra.mxu0 %v1012_v48  ;;  %627 = vmatprep.mubr.bf16.mxu0 %v110_v2 }
  0x59   :  { %588 = vmatmul.mubr.bf16.vlgmr.msra.gmra.mrb[0].mxu1 %v107_v49  ;;  %912 = vmatprep.subr.bf16.mxu0 %v1013_v50 }
  0x5a   :  { %945 = vmatprep.mubr.msk.bf16.mxu1 %vm1138_vm0, %v1137_v45  ;;  %944 = vmatpush3.bf16.msra.mxu1 %v1027_v58 }
  0x5b   :  { %949 = vmatprep.subr.bf16.mxu1 %v1137_v45 }
  0x5c   :  { %913 = vmatpush3.bf16.msra.mxu0 %v1014_v52 }
  0x5d   :  { %914 = vmatprep.subr.bf16.mxu0 %v1015_v53 }
  0x60   :  { %915 = vmatpush3.bf16.msra.mxu0 %v1016_v54 }
  0x61   :  { %916 = vmatprep.subr.bf16.mxu0 %v1017_v55  ;;  %946 = vmatmul.mubr.msk.bf16.vlgmr.msra.gmra.mrb[4].mxu1 %vm511_vm1, %v111_v3 }
  0x62   :  { %965 = vmatprep.mubr.msk.bf16.mxu1 %vm1138_vm0, %v1137_v45  ;;  %950 = vmatpush3.bf16.msra.mxu1 %v1029_v10 }
  0x63   :  { %951 = vmatprep.subr.bf16.mxu1 %v1137_v45 }
  0x64   :  { %917 = vmatpush3.bf16.msra.mxu0 %v1018_v56 }
  0x65   :  { %918 = vmatprep.subr.bf16.mxu0 %v1019_v57 }
  0x66   :  { %952 = vmatpush3.bf16.msra.mxu1 %v1030_v11 }
  0x67   :  { %953 = vmatprep.subr.bf16.mxu1 %v1137_v45 }
  0x68   :  { %919 = vmatpush3.bf16.msra.mxu0 %v1020_v60 }
  0x69   :  { %920 = vmatprep.subr.bf16.mxu0 %v1021_v63 }
  0x6a   :  { %954 = vmatpush3.bf16.msra.mxu1 %v1031_v12 }
  0x6b   :  { %955 = vmatprep.subr.bf16.mxu1 %v1137_v45 }
  0x6c   :  { %921 = vmatpush3.bf16.msra.mxu0 %v1022_v4 }
  0x6d   :  { %922 = vmatprep.subr.bf16.mxu0 %v1023_v5 }
  0x6e   :  { %956 = vmatpush3.bf16.msra.mxu1 %v1032_v13 }
  0x6f   :  { %957 = vmatprep.subr.bf16.mxu1 %v1137_v45 }
  0x70   :  { %923 = vmatpush3.bf16.msra.mxu0 %v1024_v6 }
  0x71   :  { %924 = vmatprep.subr.bf16.mxu0 %v1025_v7 }
  0x72   :  { %958 = vmatpush3.bf16.msra.mxu1 %v1033_v14 }
  0x73   :  { %959 = vmatprep.subr.bf16.mxu1 %v1137_v45 }
  0x74   :  { %925 = vmatpush3.bf16.msra.mxu0 %v1026_v8 }
  0x76   :  { %960 = vmatpush3.bf16.msra.mxu1 %v1034_v15 }
  0x77   :  { %628 = vmatmul.mubr.bf16.vlgmr.msra.gmra.mrb[4].mxu0 %v109_v9  ;;  %961 = vmatprep.subr.bf16.mxu1 %v1137_v45 }
  0x7a   :  { %962 = vmatpush3.bf16.msra.mxu1 %v1035_v16 }
  0x7b   :  { %963 = vmatprep.subr.bf16.mxu1 %v1137_v45 }
  0x7e   :  { %964 = vmatpush3.bf16.msra.mxu1 %v1036_v17 }
 0x12a   :  { %v882_v18 = vpop.f32.mrb[0].mxu0 }
 0x12b   :  { %v883_v20 = vpop.f32.mrb[1].mxu0 }
 0x12c   :  { %v884_v21 = vadd.f32 %v883_v20, %v882_v18  ;;  %v885_v22 = vpop.f32.mrb[2].mxu0  ;;  %v904_v23 = vpop.f32.mrb[0].mxu1 }
 0x12d   :  { %v886_v24 = vpop.f32.mrb[3].mxu0  ;;  %v905_v25 = vpop.f32.mrb[1].mxu1 }
 0x12e   :  { %v550_v26 = vadd.f32 %v884_v21, %v806_v19  ;;  %v906_v27 = vadd.f32 %v905_v25, %v904_v23  ;;  %v907_v28 = vpop.f32.mrb[2].mxu1 }
 0x12f   :  { %v908_v29 = vpop.f32.mrb[3].mxu1 }
 0x130   :  { %v590_v30 = vadd.f32 %v906_v27, %v550_v26 }
 0x134   :  { %v669_v31 = vpop.f32.mrb[4].mxu1 }
 0x135   :  { %v947_v32 = vpop.f32.mrb[5].mxu1 }
 0x136   :  { %v672_v33 = vpop.f32.mrb[6].mxu1 }
 0x137   :  { %v948_v34 = vpop.f32.mrb[7].mxu1 }
 0x14a   :  { %v926_v35 = vpop.f32.mrb[4].mxu0 }
 0x14b   :  { %v927_v36 = vpop.f32.mrb[5].mxu0 }
 0x14c   :  { %v928_v37 = vadd.f32 %v927_v36, %v926_v35  ;;  %v929_v38 = vpop.f32.mrb[6].mxu0 }
 0x14d   :  { %v930_v39 = vpop.f32.mrb[7].mxu0 }
 0x14e   :  { %v630_v40 = vadd.f32 %v928_v37, %v590_v30 }
 0x150   :  { %v670_v41 = vadd.f32 %v669_v31, %v630_v40 }
 0x152   :  { %v675_v42 = vmax.f32 %v670_v41, 0.0 }
 0x154   :  { %v676_v43 = vpack.c.bf16 %v675_v42, %v675_v42 }
 0x156   :  { %966 = vmatmul.mubr.bf16.vlgmr.msra.gmra.mrb[8].mxu1 %v676_v43 }
 0x229   :  { %v782_v45 = vpop.f32.mrb[8].mxu1 }
 0x22a   :  { %v783_v46 = vadd.f32 %v857_v44, %v782_v45  ;;  %v967_v47 = vpop.f32.mrb[9].mxu1 }
 0x22b   :  { %v785_v48 = vpop.f32.mrb[10].mxu1 }
 0x22c   :  { %v788_v49 = vpack.c.bf16 %v783_v46, %v783_v46  ;;  %v968_v50 = vpop.f32.mrb[11].mxu1 }
 0x22e   :  { %789 = vst [vmem:[#allocation8] sm:$0x1] %v788_v49 }
 0x22f   :  { %1114 = shalt.err (!%p1111_p0)
}
 0x230   :  { %s1115_s11 = scalar_lea.hbm %s1249_s5, 16 }
 0x231   :  { %p1116_p1 = scmp.ne.s32.totalorder %s1249_s5, %s1115_s11  ;;  %p1119_p2 = scmp.lt.u32.totalorder %s1115_s11, %s1249_s5 }
 0x233   :  { %p1121_p3 = pnand %p1119_p2, %p1116_p1 }
 0x235   :  { %1124 = shalt.err (!%p1121_p3)
}
 0x236   :  { %799 = dma.vmem_to_hbm [thread:$0]  %s797_s7, 16, %s1249_s5, [#allocation4]  }
 0x237   :  { %1129 = dma.done.wait [#allocation4], 16  }
 0x238   :  { %1130 = vsyncadd [#allocation4], 4294967280 }
 0x239   :  { %803 = vsyncpa [#allocation3], 1 }
 0x23a   :  { %804 = vsyncpa [#allocation6], 1 }
 0x23b   :  { %805 = vsyncpa [#allocation4], 1 }

</bundles_post_ra>
